<compile_context>
chip_gen: v7x
topology: tpu7x:2x2x1
jax: 0.10.0
libtpu: 0.0.40
codegen_flags: <defaults>
</compile_context>

<pallas_src>
import functools

import jax
import jax.numpy as jnp
from jax import lax
from jax.experimental import pallas as pl
from jax.experimental.pallas import tpu as pltpu

TINY_NUMBER = 1e-6
LANES = 128                 # rays packed per row (lane dim of the mask block)
ROW_WIDTH = 3 * LANES       # 384 rgb values per packed row
ROW_TILE = 1024             # rows per grid step (1024 rows = 131072 rays)
# TODO(synk): ROW_TILE=2048 fits v6e/v7x VMEM and shaves per-step overhead; 1024
# is kept so the f32 worst case also fits comfortably on v5e.
VMEM_LIMIT = 48 * 1024 * 1024   # < physical VMEM on v5e/v6e (128M) and v7x (64M)


def _plan(rows):
    """Static tiling plan for a packed row count."""
    tr = rows if rows <= ROW_TILE else ROW_TILE          # full-dim block for small inputs
    nb = pl.cdiv(rows, tr)                               # total logical blocks
    nc = 2 if nb >= 2 else 1                             # TensorCore split (v7x megacore)
    nb2 = pl.cdiv(nb, nc)                                # blocks per core
    need_tail = (nc * nb2 * tr) != rows                  # last block ragged / out of range
    need_clamp = (nc * nb2) > nb                         # a fully OOB logical block exists
    return tr, nb, nc, nb2, need_tail, need_clamp


def _in_map(nb, nb2, need_clamp):
    def index_map(c, j):
        blk = c * nb2 + j
        if need_clamp:
            # Fully out-of-range logical blocks re-read the last valid block; their
            # contribution is zeroed in-kernel via the row-validity mask.
            blk = jnp.minimum(blk, nb - 1)
        return (blk, 0)
    return index_map


def _build_e(e_ref):
    # E[j, k] = 1 iff lane j of a packed rgb row belongs to ray-lane k (j // 3 == k).
    r = lax.broadcasted_iota(jnp.int32, (ROW_WIDTH, LANES), 0)
    c3 = lax.broadcasted_iota(jnp.int32, (ROW_WIDTH, LANES), 1) * 3
    e_ref[...] = ((r >= c3) & (r < c3 + 3)).astype(jnp.float32)


def _masked_kernel(rows, tr, nb2, need_tail,
                   pred_ref, gt_ref, mask_ref, osq_ref, omk_ref, e_ref):
    c = pl.program_id(0)
    j = pl.program_id(1)

    @pl.when(j == 0)
    def _init():
        _build_e(e_ref)
        osq_ref[...] = jnp.zeros_like(osq_ref)
        omk_ref[...] = jnp.zeros_like(omk_ref)

    d = pred_ref[...].astype(jnp.float32) - gt_ref[...].astype(jnp.float32)   # (tr, 384)
    # Per-ray channel sums on the otherwise-idle MXU.
    # TODO(synk): on v5e, downcasting d*d (and E) to bf16 here keeps the kernel
    # DMA-bound once inputs stream as bf16, at ~1e-3 relative accuracy cost.
    per_ray = jnp.dot(d * d, e_ref[...], preferred_element_type=jnp.float32)  # (tr, 128)
    m = mask_ref[...].astype(jnp.float32)                                     # (tr, 128)

    if need_tail:
        # Rows >= `rows` are unspecified VMEM (possibly NaN/Inf): select, don't multiply.
        row0 = (c * nb2 + j) * tr
        sub = lax.broadcasted_iota(jnp.int32, (tr, LANES), 0)
        valid = (row0 + sub) < rows
        per_ray = jnp.where(valid, per_ray, 0.0)
        m = jnp.where(valid, m, 0.0)

    # Fold this step over sublanes into the tiny resident output block.
    osq_ref[...] += jnp.sum(per_ray * m, axis=0, keepdims=True).reshape(1, 1, LANES)
    omk_ref[...] += jnp.sum(m, axis=0, keepdims=True).reshape(1, 1, LANES)


def _unmasked_kernel(rows, tr, nb2, need_tail, pred_ref, gt_ref, osq_ref):
    c = pl.program_id(0)
    j = pl.program_id(1)

    @pl.when(j == 0)
    def _init():
        osq_ref[...] = jnp.zeros_like(osq_ref)

    d = pred_ref[...].astype(jnp.float32) - gt_ref[...].astype(jnp.float32)   # (tr, 384)
    dd = d * d
    if need_tail:
        row0 = (c * nb2 + j) * tr
        sub = lax.broadcasted_iota(jnp.int32, (tr, ROW_WIDTH), 0)
        dd = jnp.where((row0 + sub) < rows, dd, 0.0)
    osq_ref[...] += jnp.sum(dd, axis=0, keepdims=True).reshape(1, 1, ROW_WIDTH)


@jax.jit
def _masked_sums(pred2, gt2, mask2):
    rows = pred2.shape[0]
    tr, nb, nc, nb2, need_tail, need_clamp = _plan(rows)
    in_map = _in_map(nb, nb2, need_clamp)
    out_map = lambda c, j: (c, 0, 0)
    kernel = functools.partial(_masked_kernel, rows, tr, nb2, need_tail)
    osq, omk = pl.pallas_call(
        kernel,
        out_shape=(jax.ShapeDtypeStruct((nc, 1, LANES), jnp.float32),
                   jax.ShapeDtypeStruct((nc, 1, LANES), jnp.float32)),
        grid_spec=pltpu.PrefetchScalarGridSpec(
            num_scalar_prefetch=0,
            grid=(nc, nb2),
            in_specs=[
                pl.BlockSpec((tr, ROW_WIDTH), in_map),
                pl.BlockSpec((tr, ROW_WIDTH), in_map),
                pl.BlockSpec((tr, LANES), in_map),
            ],
            out_specs=(pl.BlockSpec((1, 1, LANES), out_map),
                       pl.BlockSpec((1, 1, LANES), out_map)),
            scratch_shapes=[pltpu.VMEM((ROW_WIDTH, LANES), jnp.float32)],  # E matrix
        ),
        compiler_params=pltpu.CompilerParams(
            dimension_semantics=("parallel", "arbitrary"),
            vmem_limit_bytes=VMEM_LIMIT),
    )(pred2, gt2, mask2)
    return jnp.sum(osq), jnp.sum(omk)


@jax.jit
def _unmasked_sum(pred2, gt2):
    rows = pred2.shape[0]
    tr, nb, nc, nb2, need_tail, need_clamp = _plan(rows)
    in_map = _in_map(nb, nb2, need_clamp)
    out_map = lambda c, j: (c, 0, 0)
    kernel = functools.partial(_unmasked_kernel, rows, tr, nb2, need_tail)
    osq = pl.pallas_call(
        kernel,
        out_shape=jax.ShapeDtypeStruct((nc, 1, ROW_WIDTH), jnp.float32),
        grid_spec=pltpu.PrefetchScalarGridSpec(
            num_scalar_prefetch=0,
            grid=(nc, nb2),
            in_specs=[
                pl.BlockSpec((tr, ROW_WIDTH), in_map),
                pl.BlockSpec((tr, ROW_WIDTH), in_map),
            ],
            out_specs=pl.BlockSpec((1, 1, ROW_WIDTH), out_map),
        ),
        compiler_params=pltpu.CompilerParams(
            dimension_semantics=("parallel", "arbitrary"),
            vmem_limit_bytes=VMEM_LIMIT),
    )(pred2, gt2)
    return jnp.sum(osq)


def img2mse(pred_rgb, gt_rgb, mask=None):
    """pred_rgb, gt_rgb: (..., 3). mask: (...,) or None. Returns scalar f32 loss."""
    pred = jnp.asarray(pred_rgb)
    gt = jnp.asarray(gt_rgb)
    if not jnp.issubdtype(pred.dtype, jnp.floating):
        pred = pred.astype(jnp.float32)
    if not jnp.issubdtype(gt.dtype, jnp.floating):
        gt = gt.astype(jnp.float32)
    pred = pred.reshape(-1, 3)
    gt = gt.reshape(-1, 3)
    n = pred.shape[0]

    mask_a = None
    if mask is not None:
        mask_a = jnp.asarray(mask).reshape(-1)
        if mask_a.dtype == jnp.bool_:
            mask_a = mask_a.astype(jnp.int8)   # 1-byte stream; cast to f32 in-kernel

    rows = pl.cdiv(n, LANES)
    n_pad = rows * LANES
    if n_pad != n:
        # <=127-ray tail pad so the lane-dense reshape exists; padded rays have
        # diff == 0 and mask == 0, so neither sum changes.
        # TODO(synk): this still copies the arrays once in XLA; a separate tiny
        # jnp tail reduction would avoid it at the cost of a second dispatch.
        pad = n_pad - n
        pred = jnp.pad(pred, ((0, pad), (0, 0)))
        gt = jnp.pad(gt, ((0, pad), (0, 0)))
        if mask_a is not None:
            mask_a = jnp.pad(mask_a, ((0, pad),))

    pred2 = pred.reshape(rows, ROW_WIDTH)   # row-major reshape: no transpose, no copy
    gt2 = gt.reshape(rows, ROW_WIDTH)

    if mask_a is None:
        ssq = _unmasked_sum(pred2, gt2)
        return ssq / jnp.float32(n * 3)                     # torch.mean((x - y) ** 2)
    mask2 = mask_a.reshape(rows, LANES)
    ssq, sm = _masked_sums(pred2, gt2, mask2)
    return ssq / (sm * jnp.float32(3.0) + jnp.float32(TINY_NUMBER))


class Criterion:
    """JAX/Pallas port of evenerf Criterion (no parameters)."""

    def __call__(self, outputs, ray_batch, scalars_to_log):
        pred_rgb = outputs["rgb"]
        pred_mask = outputs["mask"] if "mask" in outputs else None   # f32 cast is in-kernel
        gt_rgb = ray_batch["rgb"]
        rgb_loss = img2mse(pred_rgb, gt_rgb, pred_mask)
        loss = rgb_loss + 0
        return (loss, rgb_loss, scalars_to_log)


if __name__ == "__main__":
    key = jax.random.PRNGKey(0)
    k1, k2, k3 = jax.random.split(key, 3)
    crit = Criterion()

    def ref_masked(p, g, m):
        p = p.astype(jnp.float32)
        g = g.astype(jnp.float32)
        m = m.astype(jnp.float32)
        return jnp.sum((p - g) ** 2 * m[:, None]) / (jnp.sum(m) * 3 + TINY_NUMBER)

    # 1) small masked case (512 rays, f32, float mask)
    n = 512
    p = jax.random.uniform(k1, (n, 3), dtype=jnp.float32)
    g = jax.random.uniform(k2, (n, 3), dtype=jnp.float32)
    m = (jax.random.uniform(k3, (n,)) > 0.3).astype(jnp.float32)
    loss, rgb_loss, _ = crit({"rgb": p, "mask": m}, {"rgb": g}, {})
    loss = jax.block_until_ready(loss)
    assert jnp.allclose(loss, ref_masked(p, g, m), rtol=1e-5, atol=1e-6), loss
    assert jnp.allclose(rgb_loss, loss), (rgb_loss, loss)

    # 2) mask-less path (dedicated kernel, no ones-mask traffic)
    loss_nm, _, _ = crit({"rgb": p}, {"rgb": g}, {})
    loss_nm = jax.block_until_ready(loss_nm)
    assert jnp.allclose(loss_nm, jnp.mean((p - g) ** 2), rtol=1e-5, atol=1e-6), loss_nm

    # 3) ragged ray count + bool mask (tail pad path and int8 mask streaming)
    n2 = 300
    p2 = jax.random.uniform(k1, (n2, 3), dtype=jnp.float32)
    g2 = jax.random.uniform(k2, (n2, 3), dtype=jnp.float32)
    m2 = jax.random.uniform(k3, (n2,)) > 0.5
    l2, _, _ = crit({"rgb": p2, "mask": m2}, {"rgb": g2}, {})
    l2 = jax.block_until_ready(l2)
    assert jnp.allclose(l2, ref_masked(p2, g2, m2), rtol=1e-5, atol=1e-6), l2

    # 4) bf16 streaming path (inputs stay bf16 in HBM, upcast in-kernel)
    n3 = 640
    p3 = jax.random.uniform(k2, (n3, 3), dtype=jnp.float32).astype(jnp.bfloat16)
    g3 = jax.random.uniform(k3, (n3, 3), dtype=jnp.float32).astype(jnp.bfloat16)
    m3 = (jax.random.uniform(k1, (n3,)) > 0.4).astype(jnp.float32)
    l3, _, _ = crit({"rgb": p3, "mask": m3}, {"rgb": g3}, {})
    l3 = jax.block_until_ready(l3)
    assert jnp.allclose(l3, ref_masked(p3, g3, m3), rtol=1e-4, atol=1e-6), l3

    # 5) multi-block case: exercises the 2-way core split, the cdiv tail masking
    #    and the clamped out-of-range logical block (3 blocks over 2 cores).
    n4 = 2048 * LANES + 5000
    p4 = jax.random.uniform(k1, (n4, 3), dtype=jnp.float32)
    g4 = jax.random.uniform(k2, (n4, 3), dtype=jnp.float32)
    m4 = (jax.random.uniform(k3, (n4,)) > 0.5).astype(jnp.float32)
    l4, _, _ = crit({"rgb": p4, "mask": m4}, {"rgb": g4}, {})
    l4 = jax.block_until_ready(l4)
    assert jnp.allclose(l4, ref_masked(p4, g4, m4), rtol=1e-4, atol=1e-6), l4
    l4u, _, _ = crit({"rgb": p4}, {"rgb": g4}, {})
    l4u = jax.block_until_ready(l4u)
    assert jnp.allclose(l4u, jnp.mean((p4 - g4) ** 2), rtol=1e-4, atol=1e-6), l4u

    print("KERNEL_OK")
</pallas_src>

<mosaic_0001>
module attributes {stable_mosaic.version = 11 : i64} {
  func.func @_masked_kernel(%arg0: i32, %arg1: i32, %arg2: memref<4x384xf32, #tpu.memory_space<vmem>>, %arg3: memref<4x384xf32, #tpu.memory_space<vmem>>, %arg4: memref<4x128xf32, #tpu.memory_space<vmem>>, %arg5: memref<1x1x128xf32, #tpu.memory_space<vmem>>, %arg6: memref<1x1x128xf32, #tpu.memory_space<vmem>>, %arg7: memref<384x128xf32, #tpu.memory_space<vmem>>) attributes {dimension_semantics = [#tpu.dimension_semantics<parallel>, #tpu.dimension_semantics<arbitrary>], iteration_bounds = array<i64: 1, 1>, scalar_prefetch = 0 : i64, scratch_operands = 1 : i64, tpu.core_type = #tpu.core_type<tc>, window_params = [{transform_indices = @transform_0, window_bounds = array<i64: 4, 384>}, {transform_indices = @transform_1, window_bounds = array<i64: 4, 384>}, {transform_indices = @transform_2, window_bounds = array<i64: 4, 128>}, {transform_indices = @transform_3, window_bounds = array<i64: 1, 1, 128>}, {transform_indices = @transform_4, window_bounds = array<i64: 1, 1, 128>}]} {
    %c0_i32 = arith.constant 0 : i32
    %0 = arith.cmpi eq, %arg1, %c0_i32 : i32
    %1 = arith.extui %0 : i1 to i32
    %c0_i32_0 = arith.constant 0 : i32
    %2 = arith.cmpi ne, %1, %c0_i32_0 : i32
    scf.if %2 {
      %23 = tpu.iota {dimensions = array<i32: 0>} : vector<384x128xi32>
      %24 = tpu.iota {dimensions = array<i32: 1>} : vector<384x128xi32>
      %c3_i32 = arith.constant 3 : i32
      %25 = vector.broadcast %c3_i32 : i32 to vector<384x128xi32>
      %26 = arith.muli %24, %25 : vector<384x128xi32>
      %27 = arith.cmpi sge, %23, %26 : vector<384x128xi32>
      %c3_i32_22 = arith.constant 3 : i32
      %28 = vector.broadcast %c3_i32_22 : i32 to vector<384x128xi32>
      %29 = arith.addi %26, %28 : vector<384x128xi32>
      %30 = arith.cmpi slt, %23, %29 : vector<384x128xi32>
      %31 = arith.andi %27, %30 : vector<384x128xi1>
      %32 = arith.extui %31 : vector<384x128xi1> to vector<384x128xi32>
      %33 = arith.sitofp %32 : vector<384x128xi32> to vector<384x128xf32>
      %c0_23 = arith.constant 0 : index
      %c0_24 = arith.constant 0 : index
      %34 = vector.load %arg7[%c0_23, %c0_24] : memref<384x128xf32, #tpu.memory_space<vmem>>, vector<384x128xf32>
      tpu.vector_store %arg7[%c0_23, %c0_24], %33 {strides = array<i32>} : memref<384x128xf32, #tpu.memory_space<vmem>>, vector<384x128xf32>,
      %cst_25 = arith.constant 0.000000e+00 : f32
      %35 = vector.broadcast %cst_25 : f32 to vector<1x1x128xf32>
      %c0_26 = arith.constant 0 : index
      %c0_27 = arith.constant 0 : index
      %c0_28 = arith.constant 0 : index
      %36 = vector.load %arg5[%c0_26, %c0_27, %c0_28] : memref<1x1x128xf32, #tpu.memory_space<vmem>>, vector<1x1x128xf32>
      tpu.vector_store %arg5[%c0_26, %c0_27, %c0_28], %35 {strides = array<i32>} : memref<1x1x128xf32, #tpu.memory_space<vmem>>, vector<1x1x128xf32>,
      %cst_29 = arith.constant 0.000000e+00 : f32
      %37 = vector.broadcast %cst_29 : f32 to vector<1x1x128xf32>
      %c0_30 = arith.constant 0 : index
      %c0_31 = arith.constant 0 : index
      %c0_32 = arith.constant 0 : index
      %38 = vector.load %arg6[%c0_30, %c0_31, %c0_32] : memref<1x1x128xf32, #tpu.memory_space<vmem>>, vector<1x1x128xf32>
      tpu.vector_store %arg6[%c0_30, %c0_31, %c0_32], %37 {strides = array<i32>} : memref<1x1x128xf32, #tpu.memory_space<vmem>>, vector<1x1x128xf32>,
    } else {
    }
    %c0 = arith.constant 0 : index
    %c0_1 = arith.constant 0 : index
    %3 = vector.load %arg2[%c0, %c0_1] : memref<4x384xf32, #tpu.memory_space<vmem>>, vector<4x384xf32>
    %c0_2 = arith.constant 0 : index
    %c0_3 = arith.constant 0 : index
    %4 = vector.load %arg3[%c0_2, %c0_3] : memref<4x384xf32, #tpu.memory_space<vmem>>, vector<4x384xf32>
    %5 = arith.subf %3, %4 : vector<4x384xf32>
    %6 = arith.mulf %5, %5 : vector<4x384xf32>
    %c0_4 = arith.constant 0 : index
    %c0_5 = arith.constant 0 : index
    %7 = vector.load %arg7[%c0_4, %c0_5] : memref<384x128xf32, #tpu.memory_space<vmem>>, vector<384x128xf32>
    %cst = arith.constant dense<0.000000e+00> : vector<4x128xf32>
    %8 = tpu.matmul %6, %7, %cst {dimension_numbers = #tpu.dot_dimension_numbers<[1], [0], [0], [1], [0, 0, 1, 1], [], []>} : vector<4x384xf32>, vector<384x128xf32>, vector<4x128xf32> -> vector<4x128xf32>
    %c0_6 = arith.constant 0 : index
    %c0_7 = arith.constant 0 : index
    %9 = vector.load %arg4[%c0_6, %c0_7] : memref<4x128xf32, #tpu.memory_space<vmem>>, vector<4x128xf32>
    %c0_8 = arith.constant 0 : index
    %c0_9 = arith.constant 0 : index
    %c0_10 = arith.constant 0 : index
    %10 = vector.load %arg5[%c0_8, %c0_9, %c0_10] : memref<1x1x128xf32, #tpu.memory_space<vmem>>, vector<1x1x128xf32>
    %11 = arith.mulf %8, %9 : vector<4x128xf32>
    %cst_11 = arith.constant dense<0.000000e+00> : vector<128xf32>
    %12 = vector.multi_reduction <add>, %11, %cst_11 [0] : vector<4x128xf32> to vector<128xf32>
    %13 = vector.shape_cast %12 : vector<128xf32> to vector<1x128xf32>
    %14 = vector.shape_cast %13 : vector<1x128xf32> to vector<1x1x128xf32>
    %15 = arith.addf %10, %14 : vector<1x1x128xf32>
    %c0_12 = arith.constant 0 : index
    %c0_13 = arith.constant 0 : index
    %c0_14 = arith.constant 0 : index
    %16 = vector.load %arg5[%c0_12, %c0_13, %c0_14] : memref<1x1x128xf32, #tpu.memory_space<vmem>>, vector<1x1x128xf32>
    tpu.vector_store %arg5[%c0_12, %c0_13, %c0_14], %15 {strides = array<i32>} : memref<1x1x128xf32, #tpu.memory_space<vmem>>, vector<1x1x128xf32>,
    %c0_15 = arith.constant 0 : index
    %c0_16 = arith.constant 0 : index
    %c0_17 = arith.constant 0 : index
    %17 = vector.load %arg6[%c0_15, %c0_16, %c0_17] : memref<1x1x128xf32, #tpu.memory_space<vmem>>, vector<1x1x128xf32>
    %cst_18 = arith.constant dense<0.000000e+00> : vector<128xf32>
    %18 = vector.multi_reduction <add>, %9, %cst_18 [0] : vector<4x128xf32> to vector<128xf32>
    %19 = vector.shape_cast %18 : vector<128xf32> to vector<1x128xf32>
    %20 = vector.shape_cast %19 : vector<1x128xf32> to vector<1x1x128xf32>
    %21 = arith.addf %17, %20 : vector<1x1x128xf32>
    %c0_19 = arith.constant 0 : index
    %c0_20 = arith.constant 0 : index
    %c0_21 = arith.constant 0 : index
    %22 = vector.load %arg6[%c0_19, %c0_20, %c0_21] : memref<1x1x128xf32, #tpu.memory_space<vmem>>, vector<1x1x128xf32>
    tpu.vector_store %arg6[%c0_19, %c0_20, %c0_21], %21 {strides = array<i32>} : memref<1x1x128xf32, #tpu.memory_space<vmem>>, vector<1x1x128xf32>,
    return
  }
  func.func @transform_0(%arg0: i32, %arg1: i32) -> (i32, i32) {
    %c1_i32 = arith.constant 1 : i32
    %0 = arith.muli %arg0, %c1_i32 : i32
    %1 = arith.addi %0, %arg1 : i32
    %c0_i32 = arith.constant 0 : i32
    %c0_i32_0 = arith.constant 0 : i32
    return %1, %c0_i32 : i32, i32
  }
  func.func @transform_1(%arg0: i32, %arg1: i32) -> (i32, i32) {
    %c1_i32 = arith.constant 1 : i32
    %0 = arith.muli %arg0, %c1_i32 : i32
    %1 = arith.addi %0, %arg1 : i32
    %c0_i32 = arith.constant 0 : i32
    %c0_i32_0 = arith.constant 0 : i32
    return %1, %c0_i32 : i32, i32
  }
  func.func @transform_2(%arg0: i32, %arg1: i32) -> (i32, i32) {
    %c1_i32 = arith.constant 1 : i32
    %0 = arith.muli %arg0, %c1_i32 : i32
    %1 = arith.addi %0, %arg1 : i32
    %c0_i32 = arith.constant 0 : i32
    %c0_i32_0 = arith.constant 0 : i32
    return %1, %c0_i32 : i32, i32
  }
  func.func @transform_3(%arg0: i32, %arg1: i32) -> (i32, i32, i32) {
    %c0_i32 = arith.constant 0 : i32
    %c0_i32_0 = arith.constant 0 : i32
    %c0_i32_1 = arith.constant 0 : i32
    return %arg0, %c0_i32, %c0_i32_0 : i32, i32, i32
  }
  func.func @transform_4(%arg0: i32, %arg1: i32) -> (i32, i32, i32) {
    %c0_i32 = arith.constant 0 : i32
    %c0_i32_0 = arith.constant 0 : i32
    %c0_i32_1 = arith.constant 0 : i32
    return %arg0, %c0_i32, %c0_i32_0 : i32, i32, i32
  }
}

</mosaic_0001>

<bundles_post_ra>
// kernel: _masked_sums.1
= control target key start
LH: loop header
LB: loop body
LE: loop exit
PB: predicated region body
PF: predicated region fallthrough
CT: control target
= control target key end

     0   :  { %10 = vsyncpa [#allocation4], 0  ;;  %s1306_s0 = inlined_call_operand.hbm [shape: f32[4,384], index: 0, kind: input, shape index: {}]   ;;  %s1307_s1 = inlined_call_operand.hbm [shape: f32[4,384], index: 1, kind: input, shape index: {}]   ;;  %s1308_s2 = inlined_call_operand.vmem [shape: f32[4,128], index: 2, kind: input, shape index: {}]   ;;  %s1309_s3 = inlined_call_operand.vmem [shape: f32[1,1,128], index: 3, kind: output, shape index: {0}]   ;;  %s1310_s4 = inlined_call_operand.vmem [shape: f32[1,1,128], index: 4, kind: output, shape index: {1}]  }
   0x1   :  { %11 = vsyncpa [#allocation6], 0  ;;  %s945_s15 = smov [#allocation3]   ;;  %s946_s17 = smov [#allocation5]  }
   0x2   :  { %s22_s16 = sshll.u32 %s945_s15, 4  ;;  %s36_s18 = sshll.u32 %s946_s17, 4  ;;  %s23_s16 = int_to_ptr.vmem [resolvable:$true] %s22_s16  ;;  %s37_s18 = int_to_ptr.vmem [resolvable:$true] %s36_s18 }
   0x3   :  { %s897_s21 = scalar_lea.hbm %s1306_s0, 192 }
   0x4   :  { %p898_p0 = scmp.ne.s32.totalorder %s1306_s0, %s897_s21  ;;  %p901_p1 = scmp.lt.u32.totalorder %s897_s21, %s1306_s0 }
   0x6   :  { %p903_p2 = pnand %p901_p1, %p898_p0 }
   0x8   :  { %906 = shalt.err (!%p903_p2)
}
   0x9   :  { %s907_s26 = scalar_lea.vmem %s23_s16, 192  ;;  %p912_p4 = scmp.lt.s32.totalorder %s23_s16, %s23_s16 }
   0xa   :  { %p908_p3 = scmp.ne.s32.totalorder %s23_s16, %s907_s26  ;;  %p913_p5 = scmp.lt.s32.totalorder %s907_s26, %s907_s26 }
   0xc   :  { %p914_p6 = por %p913_p5, %p912_p4 }
   0xe   :  { %p915_p7 = pnand %p914_p6, %p908_p3 }
  0x10   :  { %918 = shalt.err (!%p915_p7)
}
  0x11   :  { %25 = dma.hbm_to_vmem [thread:$0]  %s1306_s0, 192, %s23_s16, [#allocation4]  }
  0x12   :  { %s919_s5 = scalar_lea.hbm %s1307_s1, 192 }
  0x13   :  { %p920_p8 = scmp.ne.s32.totalorder %s1307_s1, %s919_s5  ;;  %p923_p9 = scmp.lt.u32.totalorder %s919_s5, %s1307_s1 }
  0x15   :  { %p925_p10 = pnand %p923_p9, %p920_p8 }
  0x17   :  { %928 = shalt.err (!%p925_p10)
}
  0x18   :  { %s929_s10 = scalar_lea.vmem %s37_s18, 192  ;;  %p934_p12 = scmp.lt.s32.totalorder %s37_s18, %s37_s18 }
  0x19   :  { %p930_p11 = scmp.ne.s32.totalorder %s37_s18, %s929_s10  ;;  %p935_p13 = scmp.lt.s32.totalorder %s929_s10, %s929_s10 }
  0x1b   :  { %p936_p0 = por %p935_p13, %p934_p12 }
  0x1d   :  { %p937_p1 = pnand %p936_p0, %p930_p11 }
  0x1f   :  { %940 = shalt.err (!%p937_p1)
}
  0x20   :  { %39 = dma.hbm_to_vmem [thread:$0]  %s1307_s1, 192, %s37_s18, [#allocation6]  }
  0x21   :  { %941 = dma.done.wait [#allocation4], 192  }
  0x22   :  { %942 = vsyncadd [#allocation4], 4294967104  ;;  %v71_v0 = vlaneseq }
  0x23   :  { %943 = dma.done.wait [#allocation6], 192  }
  0x24   :  { %944 = vsyncadd [#allocation6], 4294967104  ;;  %v947_v1 = vmov 0.0|0.0   ;;  %v948_v2 = vmov 0.0   ;;  %v1007_v3 = vshrl.u32 %v71_v0, 7  ;;  %v121_v4 = vand.u32 127, %v71_v0 }
  0x25   :  { %867 = vmatprep.subr.bf16.mxu1 %v947_v1  ;;  %412 = vst [vmem:[%s1309_s3] sm:$0x1] %v948_v2  ;;  %413 = vst [vmem:[%s1310_s4] sm:$0x1] %v948_v2  ;;  %vm949_vm0 = vmmov 0   ;;  %v950_v13 = vmov 1.0|1.0   ;;  %v414_v37 = vld [vmem:[#allocation3] sm:$0xff] }
  0x26   :  { %832 = vmatprep.mubr.msk.f32.mxu1 %vm949_vm0, %v948_v2  ;;  %v88_v5 = vadd.s32 128, %v1007_v3  ;;  %v89_v6 = vadd.s32 136, %v1007_v3  ;;  %v1011_v7 = vmul.u32 3, %v121_v4  ;;  %v73_v9 = vadd.s32 8, %v1007_v3  ;;  %v416_v38 = vld [vmem:[#allocation5] sm:$0xff] }
  0x27   :  { %v104_v10 = vadd.s32 256, %v1007_v3  ;;  %v105_v11 = vadd.s32 264, %v1007_v3  ;;  %v90_v12 = vadd.s32 144, %v1007_v3  ;;  %v91_v14 = vadd.s32 152, %v1007_v3  ;;  %v415_v62 = vld [vmem:[#allocation3 + $0x8] sm:$0xf] }
  0x28   :  { %vm139_vm1 = vcmp.ge.s32.totalorder %v88_v5, %v1011_v7  ;;  %v1015_v8 = vadd.s32 3, %v1011_v7  ;;  %vm140_vm2 = vcmp.ge.s32.totalorder %v89_v6, %v1011_v7  ;;  %vm123_vm6 = vcmp.ge.s32.totalorder %v1007_v3, %v1011_v7  ;;  %v417_v63 = vld [vmem:[#allocation5 + $0x8] sm:$0xf]  ;;  %v613_v2 = vld [vmem:[%s1308_s2] sm:$0xf] }
  0x29   :  { %vm124_vm9 = vcmp.ge.s32.totalorder %v73_v9, %v1011_v7  ;;  %vm155_vm13 = vcmp.ge.s32.totalorder %v104_v10, %v1011_v7  ;;  %vm156_vm0 = vcmp.ge.s32.totalorder %v105_v11, %v1011_v7  ;;  %v74_v15 = vadd.s32 16, %v1007_v3 }
  0x2a   :  { %vm188_vm3 = vcmp.lt.s32.totalorder %v88_v5, %v1015_v8  ;;  %vm189_vm4 = vcmp.lt.s32.totalorder %v89_v6, %v1015_v8  ;;  %vm172_vm7 = vcmp.lt.s32.totalorder %v1007_v3, %v1015_v8  ;;  %vm173_vm10 = vcmp.lt.s32.totalorder %v73_v9, %v1015_v8 }
  0x2b   :  { %vm236_vm5 = vmand %vm139_vm1, %vm188_vm3  ;;  %vm204_vm14 = vcmp.lt.s32.totalorder %v104_v10, %v1015_v8  ;;  %vm205_vm1 = vcmp.lt.s32.totalorder %v105_v11, %v1015_v8  ;;  %v75_v16 = vadd.s32 24, %v1007_v3  ;;  %v106_v17 = vadd.s32 272, %v1007_v3 }
  0x2c   :  { %vm237_vm8 = vmand %vm140_vm2, %vm189_vm4  ;;  %vm141_vm4 = vcmp.ge.s32.totalorder %v90_v12, %v1011_v7  ;;  %v107_v18 = vadd.s32 280, %v1007_v3  ;;  %v92_v19 = vadd.s32 160, %v1007_v3  ;;  %v93_v20 = vadd.s32 168, %v1007_v3  ;;  %v626_v10 = vld [vmem:[%s1310_s4] sm:$0x1] }
  0x2d   :  { %vm835_vm11 = vmpackc.low %vm237_vm8, %vm236_vm5  ;;  %vm190_vm5 = vcmp.lt.s32.totalorder %v90_v12, %v1015_v8  ;;  %vm191_vm8 = vcmp.lt.s32.totalorder %v91_v14, %v1015_v8  ;;  %v76_v21 = vadd.s32 32, %v1007_v3  ;;  %v77_v22 = vadd.s32 40, %v1007_v3 }
  0x2e   :  { %836 = vmatprep.subr.msk.bf16.mxu0 %vm835_vm11, %v950_v13  ;;  %vm220_vm12 = vmand %vm123_vm6, %vm172_vm7  ;;  %vm142_vm7 = vcmp.ge.s32.totalorder %v91_v14, %v1011_v7  ;;  %vm125_vm11 = vcmp.ge.s32.totalorder %v74_v15, %v1011_v7  ;;  %v108_v23 = vadd.s32 288, %v1007_v3  ;;  %v109_v24 = vadd.s32 296, %v1007_v3 }
  0x2f   :  { %vm221_vm15 = vmand %vm124_vm9, %vm173_vm10  ;;  %v94_v25 = vadd.s32 176, %v1007_v3  ;;  %v95_v26 = vadd.s32 184, %v1007_v3  ;;  %v78_v27 = vadd.s32 48, %v1007_v3  ;;  %v79_v28 = vadd.s32 56, %v1007_v3 }
  0x30   :  { %vm837_vm2 = vmpackc.low %vm221_vm15, %vm220_vm12  ;;  %vm174_vm12 = vcmp.lt.s32.totalorder %v74_v15, %v1015_v8  ;;  %vm175_vm15 = vcmp.lt.s32.totalorder %v75_v16, %v1015_v8  ;;  %v110_v29 = vadd.s32 304, %v1007_v3  ;;  %v111_v30 = vadd.s32 312, %v1007_v3 }
  0x31   :  { %838 = vmatpush3.bf16.msk.msra.mxu0 %vm837_vm2, %v950_v13  ;;  %vm252_vm3 = vmand %vm155_vm13, %vm204_vm14  ;;  %vm126_vm14 = vcmp.ge.s32.totalorder %v75_v16, %v1011_v7  ;;  %vm157_vm2 = vcmp.ge.s32.totalorder %v106_v17, %v1011_v7  ;;  %v1096_v32 = vadd.s32 240, %v1007_v3  ;;  %v1099_v33 = vadd.s32 248, %v1007_v3 }
  0x32   :  { %vm253_vm6 = vmand %vm156_vm0, %vm205_vm1  ;;  %v1102_v34 = vadd.s32 112, %v1007_v3  ;;  %v96_v35 = vadd.s32 192, %v1007_v3  ;;  %v97_v36 = vadd.s32 200, %v1007_v3  ;;  %v1135_v40 = vadd.s32 120, %v1007_v3 }
  0x33   :  { %vm868_vm9 = vmpackc.low %vm253_vm6, %vm252_vm3  ;;  %vm206_vm3 = vcmp.lt.s32.totalorder %v106_v17, %v1015_v8  ;;  %vm207_vm6 = vcmp.lt.s32.totalorder %v107_v18, %v1015_v8  ;;  %v418_v41 = vsub.f32 %v414_v37, %v416_v38  ;;  %v1144_v42 = vadd.s32 368, %v1007_v3 }
  0x34   :  { %869 = vmatpush3.bf16.msk.msra.mxu1 %vm868_vm9, %v950_v13  ;;  %vm238_vm10 = vmand %vm141_vm4, %vm190_vm5  ;;  %vm158_vm5 = vcmp.ge.s32.totalorder %v107_v18, %v1011_v7  ;;  %vm143_vm9 = vcmp.ge.s32.totalorder %v92_v19, %v1011_v7  ;;  %v1147_v43 = vadd.s32 376, %v1007_v3  ;;  %v80_v45 = vadd.s32 64, %v1007_v3 }
  0x35   :  { %vm239_vm13 = vmand %vm142_vm7, %vm191_vm8  ;;  %870 = vmatprep.subr.bf16.mxu1 %v947_v1  ;;  %v1164_v44 = vmul.f32 %v418_v41, %v418_v41  ;;  %v81_v46 = vadd.s32 72, %v1007_v3  ;;  %v112_v48 = vadd.s32 320, %v1007_v3  ;;  %v113_v49 = vadd.s32 328, %v1007_v3 }
  0x36   :  { %vm839_vm0 = vmpackc.low %vm239_vm13, %vm238_vm10  ;;  %vm192_vm10 = vcmp.lt.s32.totalorder %v92_v19, %v1015_v8  ;;  %vm193_vm13 = vcmp.lt.s32.totalorder %v93_v20, %v1015_v8  ;;  %v98_v50 = vadd.s32 208, %v1007_v3  ;;  %v99_v51 = vadd.s32 216, %v1007_v3 }
  0x37   :  { %840 = vmatprep.subr.msk.bf16.mxu0 %vm839_vm0, %v950_v13  ;;  %vm222_vm1 = vmand %vm125_vm11, %vm174_vm12  ;;  %vm144_vm12 = vcmp.ge.s32.totalorder %v93_v20, %v1011_v7  ;;  %vm127_vm0 = vcmp.ge.s32.totalorder %v76_v21, %v1011_v7  ;;  %v471_v47 = vcombine.high %v1164_v44, %v1164_v44  ;;  %v82_v52 = vadd.s32 80, %v1007_v3 }
  0x38   :  { %vm223_vm4 = vmand %vm126_vm14, %vm175_vm15  ;;  %v83_v53 = vadd.s32 88, %v1007_v3  ;;  %v114_v54 = vadd.s32 336, %v1007_v3  ;;  %v115_v55 = vadd.s32 344, %v1007_v3  ;;  %v100_v56 = vadd.s32 224, %v1007_v3 }
  0x39   :  { %vm841_vm7 = vmpackc.low %vm223_vm4, %vm222_vm1  ;;  %vm176_vm1 = vcmp.lt.s32.totalorder %v76_v21, %v1015_v8  ;;  %vm177_vm4 = vcmp.lt.s32.totalorder %v77_v22, %v1015_v8  ;;  %537 = vmatprep.mubr.f32.mxu0 %v471_v47  ;;  %v101_v57 = vadd.s32 232, %v1007_v3  ;;  %v84_v58 = vadd.s32 96, %v1007_v3 }
  0x3a   :  { %842 = vmatpush3.bf16.msk.msra.mxu0 %vm841_vm7, %v950_v13  ;;  %vm254_vm8 = vmand %vm157_vm2, %vm206_vm3  ;;  %vm128_vm3 = vcmp.ge.s32.totalorder %v77_v22, %v1011_v7  ;;  %vm159_vm7 = vcmp.ge.s32.totalorder %v108_v23, %v1011_v7  ;;  %v85_v59 = vadd.s32 104, %v1007_v3  ;;  %v116_v60 = vadd.s32 352, %v1007_v3 }
  0x3b   :  { %vm255_vm11 = vmand %vm158_vm5, %vm207_vm6  ;;  %v117_v61 = vadd.s32 360, %v1007_v3  ;;  %v419_v0 = vsub.f32 %v415_v62, %v417_v63 }
  0x3c   :  { %vm871_vm14 = vmpackc.low %vm255_vm11, %vm254_vm8  ;;  %vm208_vm8 = vcmp.lt.s32.totalorder %v108_v23, %v1015_v8  ;;  %vm209_vm11 = vcmp.lt.s32.totalorder %v109_v24, %v1015_v8 }
  0x3d   :  { %872 = vmatpush3.bf16.msk.msra.mxu1 %vm871_vm14, %v950_v13  ;;  %vm240_vm15 = vmand %vm143_vm9, %vm192_vm10  ;;  %vm160_vm10 = vcmp.ge.s32.totalorder %v109_v24, %v1011_v7 }
  0x3e   :  { %vm241_vm2 = vmand %vm144_vm12, %vm193_vm13  ;;  %873 = vmatprep.subr.bf16.mxu1 %v947_v1  ;;  %vm145_vm13 = vcmp.ge.s32.totalorder %v94_v25, %v1011_v7 }
  0x3f   :  { %vm843_vm5 = vmpackc.low %vm241_vm2, %vm240_vm15  ;;  %vm146_vm15 = vcmp.ge.s32.totalorder %v95_v26, %v1011_v7  ;;  %vm129_vm2 = vcmp.ge.s32.totalorder %v78_v27, %v1011_v7 }
  0x40   :  { %844 = vmatprep.subr.msk.bf16.mxu0 %vm843_vm5, %v950_v13  ;;  %vm224_vm6 = vmand %vm127_vm0, %vm176_vm1  ;;  %vm194_vm0 = vcmp.lt.s32.totalorder %v94_v25, %v1015_v8  ;;  %vm195_vm1 = vcmp.lt.s32.totalorder %v95_v26, %v1015_v8  ;;  %v614_v25 = vld [vmem:[%s1309_s3] sm:$0x1] }
  0x41   :  { %vm225_vm9 = vmand %vm128_vm3, %vm177_vm4  ;;  %vm178_vm4 = vcmp.lt.s32.totalorder %v78_v27, %v1015_v8 }
  0x42   :  { %vm845_vm12 = vmpackc.low %vm225_vm9, %vm224_vm6  ;;  %vm130_vm6 = vcmp.ge.s32.totalorder %v79_v28, %v1011_v7  ;;  %vm161_vm9 = vcmp.ge.s32.totalorder %v110_v29, %v1011_v7 }
  0x43   :  { %846 = vmatpush3.bf16.msk.msra.mxu0 %vm845_vm12, %v950_v13  ;;  %vm1086_vm14 = vmand %vm159_vm7, %vm208_vm8  ;;  %vm179_vm7 = vcmp.lt.s32.totalorder %v79_v28, %v1015_v8 }
  0x44   :  { %vm257_vm3 = vmand %vm160_vm10, %vm209_vm11  ;;  %vm162_vm10 = vcmp.ge.s32.totalorder %v111_v30, %v1011_v7  ;;  %vm217_vm11 = vcmp.lt.s32.totalorder %v117_v61, %v1015_v8 }
  0x45   :  { %vm874_vm5 = vmpackc.low %vm257_vm3, %vm1086_vm14  ;;  %vm210_vm3 = vcmp.lt.s32.totalorder %v110_v29, %v1015_v8 }
  0x46   :  { %875 = vmatpush3.bf16.msk.msra.mxu1 %vm874_vm5, %v950_v13  ;;  %vm1115_vm8 = vmand %vm145_vm13, %vm194_vm0 }
  0x47   :  { %vm243_vm14 = vmand %vm146_vm15, %vm195_vm1  ;;  %876 = vmatprep.subr.bf16.mxu1 %v947_v1  ;;  %vm180_vm15 = vcmp.lt.s32.totalorder %v80_v45, %v1015_v8 }
  0x48   :  { %vm847_vm5 = vmpackc.low %vm243_vm14, %vm1115_vm8  ;;  %vm211_vm8 = vcmp.lt.s32.totalorder %v111_v30, %v1015_v8 }
  0x49   :  { %848 = vmatprep.subr.msk.bf16.mxu0 %vm847_vm5, %v950_v13  ;;  %vm226_vm1 = vmand %vm129_vm2, %vm178_vm4  ;;  %vm196_vm2 = vcmp.lt.s32.totalorder %v96_v35, %v1015_v8 }
  0x4a   :  { %vm227_vm5 = vmand %vm130_vm6, %vm179_vm7  ;;  %vm147_vm7 = vcmp.ge.s32.totalorder %v96_v35, %v1011_v7 }
  0x4b   :  { %vm849_vm14 = vmpackc.low %vm227_vm5, %vm226_vm1  ;;  %vm148_vm5 = vcmp.ge.s32.totalorder %v97_v36, %v1011_v7 }
  0x4c   :  { %850 = vmatpush3.bf16.msk.msra.mxu0 %vm849_vm14, %v950_v13  ;;  %vm258_vm6 = vmand %vm161_vm9, %vm210_vm3  ;;  %vm197_vm14 = vcmp.lt.s32.totalorder %v97_v36, %v1015_v8  ;;  %vm131_vm3 = vcmp.ge.s32.totalorder %v80_v45, %v1011_v7 }
  0x4d   :  { %vm259_vm1 = vmand %vm162_vm10, %vm211_vm8  ;;  %vm132_vm10 = vcmp.ge.s32.totalorder %v81_v46, %v1011_v7  ;;  %vm181_vm8 = vcmp.lt.s32.totalorder %v81_v46, %v1015_v8 }
  0x4e   :  { %vm877_vm4 = vmpackc.low %vm259_vm1, %vm258_vm6 }
  0x4f   :  { %878 = vmatpush3.bf16.msk.msra.mxu1 %vm877_vm4, %v950_v13  ;;  %vm244_vm9 = vmand %vm147_vm7, %vm196_vm2  ;;  %vm163_vm2 = vcmp.ge.s32.totalorder %v112_v48, %v1011_v7  ;;  %vm212_vm7 = vcmp.lt.s32.totalorder %v112_v48, %v1015_v8 }
  0x50   :  { %vm245_vm12 = vmand %vm148_vm5, %vm197_vm14  ;;  %879 = vmatprep.subr.bf16.mxu1 %v947_v1  ;;  %vm164_vm5 = vcmp.ge.s32.totalorder %v113_v49, %v1011_v7  ;;  %vm213_vm14 = vcmp.lt.s32.totalorder %v113_v49, %v1015_v8 }
  0x51   :  { %vm851_vm6 = vmpackc.low %vm245_vm12, %vm244_vm9  ;;  %vm149_vm9 = vcmp.ge.s32.totalorder %v98_v50, %v1011_v7 }
  0x52   :  { %852 = vmatprep.subr.msk.bf16.mxu0 %vm851_vm6, %v950_v13  ;;  %vm228_vm4 = vmand %vm131_vm3, %vm180_vm15  ;;  %vm198_vm15 = vcmp.lt.s32.totalorder %v98_v50, %v1015_v8  ;;  %vm150_vm6 = vcmp.ge.s32.totalorder %v99_v51, %v1011_v7 }
  0x53   :  { %vm229_vm1 = vmand %vm132_vm10, %vm181_vm8  ;;  %vm199_vm10 = vcmp.lt.s32.totalorder %v99_v51, %v1015_v8 }
  0x54   :  { %vm853_vm0 = vmpackc.low %vm229_vm1, %vm228_vm4  ;;  %vm134_vm1 = vcmp.ge.s32.totalorder %v83_v53, %v1011_v7 }
  0x55   :  { %854 = vmatpush3.bf16.msk.msra.mxu0 %vm853_vm0, %v950_v13  ;;  %vm260_vm12 = vmand %vm163_vm2, %vm212_vm7  ;;  %vm133_vm0 = vcmp.ge.s32.totalorder %v82_v52, %v1011_v7  ;;  %vm182_vm2 = vcmp.lt.s32.totalorder %v82_v52, %v1015_v8 }
  0x56   :  { %vm261_vm3 = vmand %vm164_vm5, %vm213_vm14  ;;  %vm183_vm5 = vcmp.lt.s32.totalorder %v83_v53, %v1015_v8 }
  0x57   :  { %vm880_vm8 = vmpackc.low %vm261_vm3, %vm260_vm12 }
  0x58   :  { %881 = vmatpush3.bf16.msk.msra.mxu1 %vm880_vm8, %v950_v13  ;;  %vm246_vm4 = vmand %vm149_vm9, %vm198_vm15  ;;  %vm165_vm9 = vcmp.ge.s32.totalorder %v114_v54, %v1011_v7  ;;  %vm214_vm15 = vcmp.lt.s32.totalorder %v114_v54, %v1015_v8 }
  0x59   :  { %vm247_vm7 = vmand %vm150_vm6, %vm199_vm10  ;;  %882 = vmatprep.subr.bf16.mxu1 %v947_v1  ;;  %vm166_vm6 = vcmp.ge.s32.totalorder %v115_v55, %v1011_v7  ;;  %vm215_vm10 = vcmp.lt.s32.totalorder %v115_v55, %v1015_v8 }
  0x5a   :  { %vm855_vm14 = vmpackc.low %vm247_vm7, %vm246_vm4  ;;  %vm151_vm7 = vcmp.ge.s32.totalorder %v100_v56, %v1011_v7 }
  0x5b   :  { %856 = vmatprep.subr.msk.bf16.mxu0 %vm855_vm14, %v950_v13  ;;  %vm230_vm12 = vmand %vm133_vm0, %vm182_vm2  ;;  %vm200_vm0 = vcmp.lt.s32.totalorder %v100_v56, %v1015_v8  ;;  %vm152_vm14 = vcmp.ge.s32.totalorder %v101_v57, %v1011_v7 }
  0x5c   :  { %vm231_vm3 = vmand %vm134_vm1, %vm183_vm5  ;;  %vm201_vm1 = vcmp.lt.s32.totalorder %v101_v57, %v1015_v8 }
  0x5d   :  { %vm857_vm8 = vmpackc.low %vm231_vm3, %vm230_vm12  ;;  %vm135_vm3 = vcmp.ge.s32.totalorder %v84_v58, %v1011_v7 }
  0x5e   :  { %858 = vmatpush3.bf16.msk.msra.mxu0 %vm857_vm8, %v950_v13  ;;  %vm262_vm4 = vmand %vm165_vm9, %vm214_vm15  ;;  %vm184_vm9 = vcmp.lt.s32.totalorder %v84_v58, %v1015_v8  ;;  %vm136_vm8 = vcmp.ge.s32.totalorder %v85_v59, %v1011_v7 }
  0x5f   :  { %vm263_vm2 = vmand %vm166_vm6, %vm215_vm10  ;;  %vm185_vm6 = vcmp.lt.s32.totalorder %v85_v59, %v1015_v8 }
  0x60   :  { %vm883_vm5 = vmpackc.low %vm263_vm2, %vm262_vm4  ;;  %vm167_vm2 = vcmp.ge.s32.totalorder %v116_v60, %v1011_v7 }
  0x61   :  { %884 = vmatpush3.bf16.msk.msra.mxu1 %vm883_vm5, %v950_v13  ;;  %vm248_vm12 = vmand %vm151_vm7, %vm200_vm0  ;;  %vm216_vm7 = vcmp.lt.s32.totalorder %v116_v60, %v1015_v8  ;;  %vm168_vm5 = vcmp.ge.s32.totalorder %v117_v61, %v1011_v7 }
  0x62   :  { %vm249_vm15 = vmand %vm152_vm14, %vm201_vm1  ;;  %885 = vmatprep.subr.bf16.mxu1 %v947_v1 }
  0x63   :  { %vm859_vm10 = vmpackc.low %vm249_vm15, %vm248_vm12 }
  0x64   :  { %860 = vmatprep.subr.msk.bf16.mxu0 %vm859_vm10, %v950_v13  ;;  %vm232_vm4 = vmand %vm135_vm3, %vm184_vm9  ;;  %vm1315_vm3 = vcmp.lt.s32.totalorder %v1096_v32, %v1015_v8  ;;  %vm1316_vm9 = vcmp.ge.s32.totalorder %v1096_v32, %v1011_v7 }
  0x65   :  { %vm233_vm0 = vmand %vm136_vm8, %vm185_vm6  ;;  %vm1317_vm8 = vcmp.lt.s32.totalorder %v1099_v33, %v1015_v8  ;;  %vm1318_vm6 = vcmp.ge.s32.totalorder %v1099_v33, %v1011_v7 }
  0x66   :  { %vm861_vm14 = vmpackc.low %vm233_vm0, %vm232_vm4  ;;  %vm1320_vm4 = vcmp.ge.s32.totalorder %v1102_v34, %v1011_v7  ;;  %vm1322_vm0 = vcmp.ge.s32.totalorder %v1135_v40, %v1011_v7 }
  0x67   :  { %862 = vmatpush3.bf16.msk.msra.mxu0 %vm861_vm14, %v950_v13  ;;  %vm264_vm1 = vmand %vm167_vm2, %vm216_vm7  ;;  %vm1321_vm7 = vcmp.lt.s32.totalorder %v1135_v40, %v1015_v8 }
  0x68   :  { %vm265_vm13 = vmand %vm168_vm5, %vm217_vm11 }
  0x69   :  { %vm886_vm12 = vmpackc.low %vm265_vm13, %vm264_vm1  ;;  %vm1319_vm13 = vcmp.lt.s32.totalorder %v1102_v34, %v1015_v8  ;;  %vm1323_vm1 = vcmp.lt.s32.totalorder %v1144_v42, %v1015_v8 }
  0x6a   :  { %887 = vmatpush3.bf16.msk.msra.mxu1 %vm886_vm12, %v950_v13  ;;  %vm250_vm15 = vmand %vm1316_vm9, %vm1315_vm3  ;;  %vm1324_vm12 = vcmp.ge.s32.totalorder %v1144_v42, %v1011_v7  ;;  %vm1325_vm9 = vcmp.lt.s32.totalorder %v1147_v43, %v1015_v8 }
  0x6b   :  { %vm251_vm10 = vmand %vm1318_vm6, %vm1317_vm8  ;;  %888 = vmatprep.subr.bf16.mxu1 %v947_v1  ;;  %v421_v1 = vmul.f32 %v419_v0, %v419_v0 }
  0x6c   :  { %vm863_vm11 = vmpackc.low %vm251_vm10, %vm250_vm15  ;;  %vm1326_vm15 = vcmp.ge.s32.totalorder %v1147_v43, %v1011_v7  ;;  %vm616_vm10 = vcmask 1043456  }
  0x6d   :  { %864 = vmatprep.subr.msk.bf16.mxu0 %vm863_vm11, %v950_v13  ;;  %vm234_vm2 = vmand %vm1320_vm4, %vm1319_vm13  ;;  %v627_v3 = vsel %vm616_vm10, %v613_v2, 0.0 }
  0x6e   :  { %vm235_vm5 = vmand %vm1322_vm0, %vm1321_vm7  ;;  %v628_v4 = vrot.slane %v627_v3, 4 }
  0x6f   :  { %vm865_vm14 = vmpackc.low %vm235_vm5, %vm234_vm2 }
  0x70   :  { %866 = vmatpush3.bf16.msk.msra.mxu0 %vm865_vm14, %v950_v13  ;;  %vm266_vm3 = vmand %vm1324_vm12, %vm1323_vm1  ;;  %v629_v5 = vadd.f32 %v628_v4, %v627_v3 }
  0x71   :  { %vm267_vm8 = vmand %vm1326_vm15, %vm1325_vm9 }
  0x72   :  { %vm889_vm6 = vmpackc.low %vm267_vm8, %vm266_vm3  ;;  %v630_v6 = vrot.slane %v629_v5, 2 }
  0x73   :  { %890 = vmatpush3.bf16.msk.msra.mxu1 %vm889_vm6, %v950_v13  ;;  %538 = vmatmul.mubr.f32.vlgmr.msra.gmra.mrb[0].mxu0 %v1164_v44 }
  0x74   :  { %v631_v8 = vadd.f32 %v630_v6, %v629_v5 }
  0x76   :  { %833 = vmatmul.mubr.f32.vlgmr.msra.gmra.mrb[0].mxu1 %v421_v1  ;;  %v632_v7 = vrot.slane %v631_v8, 1 }
  0x78   :  { %v633_v9 = vadd.f32 %v632_v7, %v631_v8 }
  0x7a   :  { %v634_v11 = vadd.f32 %v633_v9, %v626_v10 }
  0x7c   :  { %635 = vst [vmem:[%s1310_s4] sm:$0x1] %v634_v11 }
 0x146   :  { %v780_v12 = vpop.f32.mrb[0].mxu0 }
 0x147   :  { %v781_v13 = vpop.f32.mrb[1].mxu0 }
 0x148   :  { %v782_v14 = vadd.f32 %v781_v13, %v780_v12 }
 0x149   :  { %v609_v15 = vpop.f32.mrb[0].mxu1 }
 0x14a   :  { %v610_v16 = vadd.f32 %v782_v14, %v609_v15  ;;  %v834_v17 = vpop.f32.mrb[1].mxu1 }
 0x14c   :  { %v615_v18 = vmul.f32 %v613_v2, %v610_v16 }
 0x14e   :  { %v617_v19 = vsel %vm616_vm10, %v615_v18, 0.0 }
 0x14f   :  { %v618_v20 = vrot.slane %v617_v19, 4 }
 0x151   :  { %v619_v21 = vadd.f32 %v618_v20, %v617_v19 }
 0x153   :  { %v620_v22 = vrot.slane %v619_v21, 2 }
 0x155   :  { %v621_v23 = vadd.f32 %v620_v22, %v619_v21 }
 0x157   :  { %v622_v24 = vrot.slane %v621_v23, 1 }
 0x159   :  { %v623_v26 = vadd.f32 %v622_v24, %v621_v23 }
 0x15b   :  { %v624_v27 = vadd.f32 %v623_v26, %v614_v25 }
 0x15d   :  { %625 = vst [vmem:[%s1309_s3] sm:$0x1] %v624_v27 }
 0x15e   :  { %644 = vsyncpa [#allocation4], 1 }
 0x15f   :  { %645 = vsyncpa [#allocation6], 1 }

</bundles_post_ra>
